<compile_context>
chip_gen: v7x
topology: tpu7x:2x2x1
jax: 0.10.0
libtpu: 0.0.40
codegen_flags: <defaults>
</compile_context>

<pallas_src>
import jax
import jax.numpy as jnp
from jax import lax
from jax.experimental import pallas as pl
from jax.experimental.pallas import tpu as pltpu


def _nce_softmax_loss_kernel(nrows_ref, logits_ref, labels_ref, psum_ref):
    # nrows_ref : SMEM (1,) int32 scalar-prefetch  -- true (unpadded) batch size
    # logits_ref: VMEM (TB, C) native dtype
    # labels_ref: VMEM (TB, 1) int32
    # psum_ref  : VMEM (1, 128) f32 -- per-tile partial sum of NLL (lane-dense)
    i = pl.program_id(0)

    x = logits_ref[...].astype(jnp.float32)             # in-kernel upcast (VPU)
    lbl = labels_ref[...]                                # (TB, 1) int32
    TB, C = x.shape

    # Numerically-stable log-sum-exp along the class (lane) axis.
    m = jnp.max(x, axis=-1, keepdims=True)               # (TB, 1)
    lse = m + jnp.log(jnp.sum(jnp.exp(x - m), axis=-1, keepdims=True))

    # Gather the logit at the label index via iota + masked reduce.
    col = lax.broadcasted_iota(jnp.int32, (TB, C), 1)     # (TB, C)
    picked = jnp.sum(jnp.where(col == lbl, x, 0.0), axis=-1, keepdims=True)

    per_row = lse - picked                                # (TB, 1) per-example NLL

    # Mask rows that are batch padding (B not a multiple of TB).
    row = i * TB + lax.broadcasted_iota(jnp.int32, (TB, 1), 0)
    per_row = jnp.where(row < nrows_ref[0], per_row, 0.0)

    # Lane-dense partial-sum store (same value replicated across 128 lanes).
    tile_sum = jnp.sum(per_row, axis=0, keepdims=True)    # (1, 1)
    psum_ref[...] = jnp.broadcast_to(tile_sum, (1, 128))


def _round_up(v, m):
    return (v + m - 1) // m * m


def nce_softmax_loss(x, label, *, block_rows=None):
    """JAX/Pallas equivalent of NCESoftmaxLoss().forward(x, label)."""
    bsz = x.shape[0]
    # reshape(bsz, -1) instead of squeeze(): matches torch for (B, K, 1) and
    # stays correct for bsz == 1 (squeeze would also drop the batch dim).
    x2 = x.reshape(bsz, -1)                               # keep NATIVE dtype
    B, C = x2.shape
    lbl = label.astype(jnp.int32).reshape(B, 1)

    # Batch tile: multiple of 8 sublanes; modest rows since C is small.
    if block_rows is None:
        block_rows = min(512, _round_up(B, 8))
    TB = max(8, _round_up(block_rows, 8))
    num_tiles = pl.cdiv(B, TB)
    B_pad = num_tiles * TB
    if B_pad != B:
        x2 = jnp.pad(x2, ((0, B_pad - B), (0, 0)))
        lbl = jnp.pad(lbl, ((0, B_pad - B), (0, 0)))

    nrows = jnp.array([B], dtype=jnp.int32)               # scalar prefetch

    psums = pl.pallas_call(
        _nce_softmax_loss_kernel,
        out_shape=jax.ShapeDtypeStruct((1, num_tiles * 128), jnp.float32),
        grid_spec=pltpu.PrefetchScalarGridSpec(
            num_scalar_prefetch=1,
            grid=(num_tiles,),
            in_specs=[
                pl.BlockSpec((TB, C), lambda i, n: (i, 0)),
                pl.BlockSpec((TB, 1), lambda i, n: (i, 0)),
            ],
            out_specs=pl.BlockSpec((1, 128), lambda i, n: (0, i)),
        ),
        compiler_params=pltpu.CompilerParams(
            dimension_semantics=("parallel",)),
    )(nrows, x2, lbl)                                     # no host-side f32 cast

    partial = psums.reshape(num_tiles, 128)[:, 0]         # one value per tile
    return jnp.sum(partial) / B                           # mean over TRUE batch


def _reference_loss(x, label):
    # Pure-JAX reference (torch CrossEntropyLoss, mean reduction).
    B = x.shape[0]
    x2 = x.reshape(B, -1).astype(jnp.float32)
    logz = jax.nn.logsumexp(x2, axis=-1)
    picked = jnp.take_along_axis(
        x2, label.astype(jnp.int32).reshape(B, 1), axis=-1)[:, 0]
    return jnp.mean(logz - picked)


if __name__ == "__main__":
    key = jax.random.PRNGKey(0)
    kx, kl = jax.random.split(key)

    # Case 1: typical NCE shape — bsz=2, K+1=33 logits, trailing singleton dim.
    B, C = 2, 33
    x = jax.random.normal(kx, (B, C, 1), dtype=jnp.float32)
    label = jnp.array([0, 3], dtype=jnp.int32)
    loss = nce_softmax_loss(x, label)
    jax.block_until_ready(loss)
    ref = _reference_loss(x, label)
    assert jnp.allclose(loss, ref, atol=1e-5, rtol=1e-5), (loss, ref)

    # Case 2: non-multiple-of-tile batch exercising the grid + row masking,
    # with native bf16 logits (no host-side f32 upcast).
    B2, C2 = 37, 33
    x2 = jax.random.normal(kl, (B2, C2, 1), dtype=jnp.float32).astype(jnp.bfloat16)
    label2 = jax.random.randint(jax.random.PRNGKey(1), (B2,), 0, C2, dtype=jnp.int32)
    loss2 = nce_softmax_loss(x2, label2, block_rows=16)
    jax.block_until_ready(loss2)
    ref2 = _reference_loss(x2, label2)
    assert jnp.allclose(loss2, ref2, atol=1e-5, rtol=1e-5), (loss2, ref2)

    print("KERNEL_OK")
</pallas_src>

<mosaic_0001>
module attributes {stable_mosaic.version = 11 : i64} {
  func.func @_nce_softmax_loss_kernel(%arg0: i32, %arg1: memref<1xi32, #tpu.memory_space<smem>>, %arg2: memref<8x33xf32, #tpu.memory_space<vmem>>, %arg3: memref<8x1xi32, #tpu.memory_space<vmem>>, %arg4: memref<1x128xf32, #tpu.memory_space<vmem>>) attributes {dimension_semantics = [#tpu.dimension_semantics<parallel>], iteration_bounds = array<i64: 1>, scalar_prefetch = 1 : i64, scratch_operands = 0 : i64, tpu.core_type = #tpu.core_type<tc>, window_params = [{transform_indices = @transform_0, window_bounds = array<i64: 8, 33>}, {transform_indices = @transform_1, window_bounds = array<i64: 8, 1>}, {transform_indices = @transform_2, window_bounds = array<i64: 1, 128>}]} {
    %c0 = arith.constant 0 : index
    %c0_0 = arith.constant 0 : index
    %0 = vector.load %arg2[%c0, %c0_0] : memref<8x33xf32, #tpu.memory_space<vmem>>, vector<8x33xf32>
    %c0_1 = arith.constant 0 : index
    %c0_2 = arith.constant 0 : index
    %1 = vector.load %arg3[%c0_1, %c0_2] : memref<8x1xi32, #tpu.memory_space<vmem>>, vector<8x1xi32>
    %cst = arith.constant dense<0xFF800000> : vector<8xf32>
    %2 = vector.multi_reduction <maximumf>, %0, %cst [1] : vector<8x33xf32> to vector<8xf32>
    %3 = vector.shape_cast %2 : vector<8xf32> to vector<8x1xf32>
    %4 = vector.broadcast %3 : vector<8x1xf32> to vector<8x33xf32>
    %5 = arith.subf %0, %4 : vector<8x33xf32>
    %6 = math.exp %5 : vector<8x33xf32>
    %cst_3 = arith.constant dense<0.000000e+00> : vector<8xf32>
    %7 = vector.multi_reduction <add>, %6, %cst_3 [1] : vector<8x33xf32> to vector<8xf32>
    %8 = vector.shape_cast %7 : vector<8xf32> to vector<8x1xf32>
    %9 = math.log %8 : vector<8x1xf32>
    %10 = arith.addf %3, %9 : vector<8x1xf32>
    %11 = tpu.iota {dimensions = array<i32: 1>} : vector<8x33xi32>
    %12 = vector.broadcast %1 : vector<8x1xi32> to vector<8x33xi32>
    %13 = arith.cmpi eq, %11, %12 : vector<8x33xi32>
    %cst_4 = arith.constant 0.000000e+00 : f32
    %14 = vector.broadcast %cst_4 : f32 to vector<8x33xf32>
    %15 = arith.select %13, %0, %14 : vector<8x33xi1>, vector<8x33xf32>
    %cst_5 = arith.constant dense<0.000000e+00> : vector<8xf32>
    %16 = vector.multi_reduction <add>, %15, %cst_5 [1] : vector<8x33xf32> to vector<8xf32>
    %17 = vector.shape_cast %16 : vector<8xf32> to vector<8x1xf32>
    %18 = arith.subf %10, %17 : vector<8x1xf32>
    %c8_i32 = arith.constant 8 : i32
    %19 = arith.muli %arg0, %c8_i32 : i32
    %20 = tpu.iota {dimensions = array<i32: 0>} : vector<8x1xi32>
    %21 = vector.broadcast %19 : i32 to vector<8x1xi32>
    %22 = arith.addi %21, %20 : vector<8x1xi32>
    %c0_6 = arith.constant 0 : index
    %23 = memref.load %arg1[%c0_6] : memref<1xi32, #tpu.memory_space<smem>>
    %24 = vector.broadcast %23 : i32 to vector<8x1xi32>
    %25 = arith.cmpi slt, %22, %24 : vector<8x1xi32>
    %cst_7 = arith.constant 0.000000e+00 : f32
    %26 = vector.broadcast %cst_7 : f32 to vector<8x1xf32>
    %27 = arith.select %25, %18, %26 : vector<8x1xi1>, vector<8x1xf32>
    %cst_8 = arith.constant dense<0.000000e+00> : vector<1xf32>
    %28 = vector.multi_reduction <add>, %27, %cst_8 [0] : vector<8x1xf32> to vector<1xf32>
    %29 = vector.shape_cast %28 : vector<1xf32> to vector<1x1xf32>
    %30 = vector.shape_cast %29 : vector<1x1xf32> to vector<1x1xf32>
    %31 = vector.broadcast %30 : vector<1x1xf32> to vector<1x128xf32>
    %c0_9 = arith.constant 0 : index
    %c0_10 = arith.constant 0 : index
    %32 = vector.load %arg4[%c0_9, %c0_10] : memref<1x128xf32, #tpu.memory_space<vmem>>, vector<1x128xf32>
    tpu.vector_store %arg4[%c0_9, %c0_10], %31 {strides = array<i32>} : memref<1x128xf32, #tpu.memory_space<vmem>>, vector<1x128xf32>,
    return
  }
  func.func @transform_0(%arg0: i32, %arg1: memref<1xi32, #tpu.memory_space<smem>>) -> (i32, i32) {
    %c0_i32 = arith.constant 0 : i32
    %c0_i32_0 = arith.constant 0 : i32
    return %arg0, %c0_i32 : i32, i32
  }
  func.func @transform_1(%arg0: i32, %arg1: memref<1xi32, #tpu.memory_space<smem>>) -> (i32, i32) {
    %c0_i32 = arith.constant 0 : i32
    %c0_i32_0 = arith.constant 0 : i32
    return %arg0, %c0_i32 : i32, i32
  }
  func.func @transform_2(%arg0: i32, %arg1: memref<1xi32, #tpu.memory_space<smem>>) -> (i32, i32) {
    %c0_i32 = arith.constant 0 : i32
    %c0_i32_0 = arith.constant 0 : i32
    return %c0_i32, %arg0 : i32, i32
  }
}

</mosaic_0001>

<bundles_post_ra>
// kernel: tpu_custom_call.1
= control target key start
LH: loop header
LB: loop body
LE: loop exit
PB: predicated region body
PF: predicated region fallthrough
CT: control target
= control target key end

     0   :  { %vm16_vm0 = vcmask 269312   ;;  %s147_s0 = inlined_call_operand.<no memory space> [shape: s32[1], index: 0, kind: input, shape index: {}]   ;;  %s148_s1 = inlined_call_operand.vmem [shape: f32[8,33], index: 1, kind: input, shape index: {}]   ;;  %s149_s2 = inlined_call_operand.vmem [shape: s32[8,1], index: 2, kind: input, shape index: {}]   ;;  %s150_s3 = inlined_call_operand.hbm [shape: f32[1,128], index: 3, kind: output, shape index: {}]  }
   0x1   :  { %v14_v0 = vld [vmem:[%s148_s1] sm:$0xff] }
   0x2   :  { %9 = vsyncpa [#allocation5], 0  ;;  %v17_v1 = vsel %vm16_vm0, %v14_v0, -inf  ;;  %v101_v2 = vmov 0   ;;  %v15_v3 = vld [vmem:[%s149_s2] sm:$0xff]  ;;  %v29_v7 = vlaneseq  ;;  %v46_v18 = vstv %s147_s0  ;;  %s102_s16 = smov [#allocation4]  }
   0x3   :  { %72 = vset.pattern.permute.xlu0 %v101_v2  ;;  %s62_s17 = sshll.u32 %s102_s16, 4  ;;  %s63_s17 = int_to_ptr.vmem [resolvable:$true] %s62_s17 }
   0x4   :  { %18 = vmax.xlane.f32.xlu0 %v17_v1  ;;  %v30_v8 = vand.u32 127, %v29_v7  ;;  %v42_v16 = vshrl.u32 %v29_v7, 7  ;;  %s77_s18 = scalar_lea.vmem %s63_s17, 16  ;;  %s81_s19 = scalar_lea.vmem %s63_s17, 32 }
   0x5   :  { %p78_p0 = scmp.ne.s32.totalorder %s63_s17, %s77_s18  ;;  %p82_p1 = scmp.lt.s32.totalorder %s63_s17, %s63_s17 }
   0x6   :  { %vm47_vm2 = vcmp.lt.s32.totalorder %v42_v16, %v46_v18  ;;  %p83_p2 = scmp.lt.s32.totalorder %s81_s19, %s77_s18 }
   0x8   :  { %p84_p3 = por %p83_p2, %p82_p1 }
   0xa   :  { %p85_p4 = pnand %p84_p3, %p78_p0 }
  0x1a   :  { %32 = vperm.xlu0 %72, %v15_v3  }
  0x91   :  { %v19_v4 = vpop.xlane.xlu0 %18 }
  0x92   :  { %v20_v5 = vsub.f32 %v14_v0, %v19_v4 }
  0x94   :  { %v21_v6 = vmul.f32 1.442695, %v20_v5 }
  0x96   :  { %73 = vpow2.f32 %v21_v6 }
  0x99   :  { %v33_v9 = vpop.permute.xlu0 %32 }
  0x9a   :  { %vm34_vm1 = vcmp.eq.s32.totalorder %v30_v8, %v33_v9 }
  0x9b   :  { %v35_v11 = vsel %vm34_vm1, %v14_v0, 0.0 }
  0x9c   :  { %v36_v13 = vsel %vm16_vm0, %v35_v11, 0.0 }
  0xa0   :  { %v74_v10 = vpop.eup %73 }
  0xa1   :  { %v23_v12 = vsel %vm16_vm0, %v74_v10, 0.0 }
  0xa2   :  { %24 = vadd.xlane.f32.xlu1 %v23_v12 }
  0xa6   :  { %37 = vadd.xlane.f32.xlu1 %v36_v13 }
 0x12f   :  { %v25_v14 = vpop.xlane.xlu1 %24 }
 0x130   :  { %75 = vlog2.f32 %v25_v14 }
 0x133   :  { %v38_v19 = vpop.xlane.xlu1 %37 }
 0x13a   :  { %v76_v15 = vpop.eup %75 }
 0x13b   :  { %v27_v17 = vmul.f32 0.6931472, %v76_v15 }
 0x13d   :  { %v28_v20 = vadd.f32 %v27_v17, %v19_v4 }
 0x13f   :  { %v39_v21 = vsub.f32 %v28_v20, %v38_v19 }
 0x141   :  { %v48_v22 = vsel %vm47_vm2, %v39_v21, 0.0 }
 0x142   :  { %v49_v23 = vrot.slane %v48_v22, 4 }
 0x144   :  { %v50_v24 = vadd.f32 %v49_v23, %v48_v22 }
 0x146   :  { %v51_v25 = vrot.slane %v50_v24, 2 }
 0x148   :  { %v52_v26 = vadd.f32 %v51_v25, %v50_v24 }
 0x14a   :  { %v53_v27 = vrot.slane %v52_v26, 1 }
 0x14c   :  { %v54_v28 = vadd.f32 %v53_v27, %v52_v26 }
 0x14e   :  { %55 = vst [vmem:[#allocation4] sm:$0x1] %v54_v28 }
 0x14f   :  { %88 = shalt.err (!%p85_p4)
}
 0x150   :  { %s89_s21 = scalar_lea.hbm %s150_s3, 16 }
 0x151   :  { %p90_p5 = scmp.ne.s32.totalorder %s150_s3, %s89_s21  ;;  %p93_p6 = scmp.lt.u32.totalorder %s89_s21, %s150_s3 }
 0x153   :  { %p95_p7 = pnand %p93_p6, %p90_p5 }
 0x155   :  { %98 = shalt.err (!%p95_p7)
}
 0x156   :  { %65 = dma.vmem_to_hbm [thread:$0]  %s63_s17, 16, %s150_s3, [#allocation5]  }
 0x157   :  { %99 = dma.done.wait [#allocation5], 16  }
 0x158   :  { %100 = vsyncadd [#allocation5], 4294967280 }
 0x159   :  { %69 = vsyncpa [#allocation5], 1 }

</bundles_post_ra>
